<compile_context>
chip_gen: v7x
topology: tpu7x:2x2x1
jax: 0.10.0
libtpu: 0.0.40
codegen_flags: <defaults>
</compile_context>

<pallas_src>
import functools
import math

import jax
import jax.numpy as jnp
from jax.experimental import pallas as pl
from jax.experimental.pallas import tpu as pltpu


_TARGET_BLOCK_BYTES = 4 * 1024 * 1024    # ~4 MiB per output block (x2 double-buffered)
_DEFAULT_MIN_PALLAS_BYTES = 256 * 1024   # below this, plain XLA beats launch overhead


def _round_up(x: int, m: int) -> int:
    return ((x + m - 1) // m) * m


def _choose_tile_rows(packed_rows: int, row_bytes: int) -> int:
    """Largest multiple-of-8 divisor of packed_rows with block <= ~4 MiB, keeping
    grid >= 2 whenever more than one minimal (8-row) tile exists (v7x dual-TC)."""
    n8 = packed_rows // 8
    max_tile = max(8, min(packed_rows, (_TARGET_BLOCK_BYTES // max(row_bytes, 1)) // 8 * 8))
    best = 8
    for d in range(1, max_tile // 8 + 1):
        if n8 % d:
            continue
        tile = 8 * d
        if packed_rows > 8 and packed_rows // tile < 2:
            continue  # would collapse to grid=1 and idle one v7x TensorCore
        best = tile
    return best


def _make_rope_kernel(tile_rows: int, k: int):
    """Writes one (tile_rows, k*out_dim) lane-dense block of the packed table.

    Packed layout: packed[r, c] = (r*k + c//out_dim) * inv_freq_full[c % out_dim]
                                = t(r) * inv_lane[c] + lane_bias[c]
    const_ref: (2, width) f32, row 0 = inv_lane = tile(inv_freq_full, k),
                               row 1 = lane_bias = (c // out_dim) * inv_lane
    """

    def kernel(const_ref, out_ref):
        base = pl.program_id(0) * (tile_rows * k)
        r = jax.lax.broadcasted_iota(jnp.int32, out_ref.shape, 0)
        t = (base + r * k).astype(jnp.float32)
        out_ref[...] = t * const_ref[0:1, :] + const_ref[1:2, :]

    return kernel


@functools.lru_cache(maxsize=None)
def _build_rope_fn(seq_len: int, half: int, min_pallas_bytes: int):
    out_dim = 2 * half
    table_bytes = seq_len * out_dim * 4

    if table_bytes < min_pallas_bytes:
        # Tiny table: compute directly in XLA (launch + dispatch overhead dominates).
        # TODO(synk): for long contexts, fuse the t*inv_freq multiply into the
        # downstream RoPE-apply / attention kernel so the table never hits HBM.
        def small_fn(inv_freq):
            inv_full = jnp.concatenate([inv_freq, inv_freq]).astype(jnp.float32)
            t = jnp.arange(seq_len, dtype=jnp.float32)
            return t[:, None] * inv_full[None, :]

        return jax.jit(small_fn)

    # Pack k sequence rows per packed row so the lane width is a multiple of 128.
    k = 128 // math.gcd(out_dim, 128)
    width = k * out_dim
    packed_rows = _round_up(-(-seq_len // k), 8)        # round only to sublane multiple
    tile_rows = _choose_tile_rows(packed_rows, width * 4)
    grid = packed_rows // tile_rows                     # tile_rows divides packed_rows

    kernel = _make_rope_kernel(tile_rows, k)

    def fn(inv_freq):
        inv_full = jnp.concatenate([inv_freq, inv_freq]).astype(jnp.float32)
        inv_lane = jnp.tile(inv_full, (k,))                                    # c % out_dim
        lane_off = (jnp.arange(width, dtype=jnp.int32) // out_dim).astype(jnp.float32)
        const = jnp.stack([inv_lane, lane_off * inv_lane], axis=0)             # (2, width)

        out_packed = pl.pallas_call(
            kernel,
            out_shape=jax.ShapeDtypeStruct((packed_rows, width), jnp.float32),
            grid_spec=pltpu.PrefetchScalarGridSpec(
                num_scalar_prefetch=0,
                grid=(grid,),
                in_specs=[pl.BlockSpec((2, width), lambda i: (0, 0))],          # resident
                out_specs=pl.BlockSpec((tile_rows, width), lambda i: (i, 0)),
            ),
            compiler_params=pltpu.CompilerParams(
                dimension_semantics=("parallel",),  # v7x: shard row tiles across both TCs
            ),
        )(const)

        # Free row-major reshape back to (packed_rows*k, out_dim); trim only when the
        # 8*k alignment padding was actually triggered (elided otherwise).
        # TODO(synk): expose the padded table to consumers that can fuse/slice later.
        table = out_packed.reshape(packed_rows * k, out_dim)
        if packed_rows * k != seq_len:
            table = table[:seq_len]
        return table

    return jax.jit(fn)


def rotary_embedding(
    seq_len: int,
    inv_freq: jax.Array,
    *,
    min_pallas_bytes: int = _DEFAULT_MIN_PALLAS_BYTES,
) -> jax.Array:
    """inv_freq: (dim//2,) float32 buffer. Returns (seq_len, 2*(dim//2)) float32.

    TODO(synk): add a bf16 output mode (in-kernel cast) for HBM-write-bound long
    contexts; kept float32 here for strict parity with the PyTorch buffer.
    """
    return _build_rope_fn(int(seq_len), int(inv_freq.shape[0]), int(min_pallas_bytes))(inv_freq)


def make_inv_freq(dim: int) -> jax.Array:
    # Deterministic buffer initialization, matching nn.Module.__init__.
    return 1.0 / (10000.0 ** (jnp.arange(0, dim, 2, dtype=jnp.float32) / dim))


def _reference(seq_len: int, inv_freq: jax.Array) -> jax.Array:
    t = jnp.arange(seq_len, dtype=jnp.float32)
    freqs = jnp.einsum("i,j->ij", t, inv_freq)
    return jnp.concatenate([freqs, freqs], axis=-1)


if __name__ == "__main__":
    # Small shapes consistent with the module: hidden dim = 32, seq_len = 8.
    dim = 32
    seq_len = 8

    # PRNGKey(0) for reproducibility convention (module has no random params).
    _ = jax.random.PRNGKey(0)

    inv_freq = make_inv_freq(dim)

    # Force the Pallas path at the small shape so the kernel itself is exercised.
    out = jax.block_until_ready(rotary_embedding(seq_len, inv_freq, min_pallas_bytes=0))
    ref = _reference(seq_len, inv_freq)
    assert out.shape == (seq_len, dim), out.shape
    assert out.dtype == jnp.float32
    assert jnp.allclose(out, ref, atol=1e-6, rtol=1e-6)

    # Default path for tiny tables short-circuits to XLA; must match too.
    out_xla = jax.block_until_ready(rotary_embedding(seq_len, inv_freq))
    assert jnp.allclose(out_xla, ref, atol=1e-6, rtol=1e-6)

    # Ragged shape (exercises k>1 packing, multi-tile grid, and trailing trim).
    seq_len_r, dim_r = 1000, 64
    inv_freq_r = make_inv_freq(dim_r)
    out_r = jax.block_until_ready(rotary_embedding(seq_len_r, inv_freq_r, min_pallas_bytes=0))
    assert out_r.shape == (seq_len_r, dim_r)
    assert jnp.allclose(out_r, _reference(seq_len_r, inv_freq_r), atol=1e-5, rtol=1e-5)

    # Larger sanity check (default path -> Pallas, adaptive tiles, grid >= 2).
    seq_len_big, dim_big = 4096, 128
    inv_freq_big = make_inv_freq(dim_big)
    out_big = jax.block_until_ready(rotary_embedding(seq_len_big, inv_freq_big))
    assert out_big.shape == (seq_len_big, dim_big)
    assert jnp.allclose(out_big, _reference(seq_len_big, inv_freq_big), atol=1e-5, rtol=1e-5)

    print("KERNEL_OK")
</pallas_src>

<mosaic_0001>
module attributes {stable_mosaic.version = 11 : i64} {
  func.func @kernel(%arg0: i32, %arg1: memref<2x128xf32, #tpu.memory_space<vmem>>, %arg2: memref<8x128xf32, #tpu.memory_space<vmem>>) attributes {dimension_semantics = [#tpu.dimension_semantics<parallel>], iteration_bounds = array<i64: 1>, scalar_prefetch = 0 : i64, scratch_operands = 0 : i64, tpu.core_type = #tpu.core_type<tc>, window_params = [{pipeline_mode = #tpu.pipeline_mode<synchronous>, transform_indices = @transform_0, window_bounds = array<i64: 2, 128>}, {transform_indices = @transform_1, window_bounds = array<i64: 8, 128>}]} {
    %c32_i32 = arith.constant 32 : i32
    %0 = arith.muli %arg0, %c32_i32 : i32
    %1 = tpu.iota {dimensions = array<i32: 0>} : vector<8x128xi32>
    %c4_i32 = arith.constant 4 : i32
    %2 = vector.broadcast %c4_i32 : i32 to vector<8x128xi32>
    %3 = arith.muli %1, %2 : vector<8x128xi32>
    %4 = vector.broadcast %0 : i32 to vector<8x128xi32>
    %5 = arith.addi %4, %3 : vector<8x128xi32>
    %6 = arith.sitofp %5 : vector<8x128xi32> to vector<8x128xf32>
    %c0 = arith.constant 0 : index
    %c0_0 = arith.constant 0 : index
    %7 = vector.load %arg1[%c0, %c0_0] : memref<2x128xf32, #tpu.memory_space<vmem>>, vector<1x128xf32>
    %8 = vector.broadcast %7 : vector<1x128xf32> to vector<8x128xf32>
    %9 = arith.mulf %6, %8 : vector<8x128xf32>
    %c1 = arith.constant 1 : index
    %c0_1 = arith.constant 0 : index
    %10 = vector.load %arg1[%c1, %c0_1] : memref<2x128xf32, #tpu.memory_space<vmem>>, vector<1x128xf32>
    %11 = vector.broadcast %10 : vector<1x128xf32> to vector<8x128xf32>
    %12 = arith.addf %9, %11 : vector<8x128xf32>
    %c0_2 = arith.constant 0 : index
    %c0_3 = arith.constant 0 : index
    %13 = vector.load %arg2[%c0_2, %c0_3] : memref<8x128xf32, #tpu.memory_space<vmem>>, vector<8x128xf32>
    tpu.vector_store %arg2[%c0_2, %c0_3], %12 {strides = array<i32>} : memref<8x128xf32, #tpu.memory_space<vmem>>, vector<8x128xf32>,
    return
  }
  func.func @transform_0(%arg0: i32) -> (i32, i32) {
    %c0_i32 = arith.constant 0 : i32
    %c0_i32_0 = arith.constant 0 : i32
    %c0_i32_1 = arith.constant 0 : i32
    return %c0_i32, %c0_i32_0 : i32, i32
  }
  func.func @transform_1(%arg0: i32) -> (i32, i32) {
    %c0_i32 = arith.constant 0 : i32
    %c0_i32_0 = arith.constant 0 : i32
    return %arg0, %c0_i32 : i32, i32
  }
}

</mosaic_0001>

<bundles_post_ra>
// kernel: tile.9
= control target key start
LH: loop header
LB: loop body
LE: loop exit
PB: predicated region body
PF: predicated region fallthrough
CT: control target
= control target key end

     0   :  { %s22_s0 = inlined_call_operand.vmem [shape: f32[32], index: 0, kind: input, shape index: {}]   ;;  %s23_s1 = inlined_call_operand.vmem [shape: f32[4,32], index: 1, kind: output, shape index: {}]  }
   0x1   :  { %v4_v0 = vld [vmem:[%s22_s0] ss:$0 sm:$0xff] }
   0x2   :  { %5 = vst [vmem:[%s23_s1] sm:$0xf] %v4_v0 }

// kernel: tile.11
= control target key start
LH: loop header
LB: loop body
LE: loop exit
PB: predicated region body
PF: predicated region fallthrough
CT: control target
= control target key end

     0   :  { %vm7_vm0 = vcmask 261120   ;;  %s37_s8 = smov 32   ;;  %s38_s9 = smov 64   ;;  %vm13_vm1 = vcmask 1048320   ;;  %vm19_vm2 = vcmask 785920   ;;  %vm25_vm3 = vcmask 523520   ;;  %s55_s0 = inlined_call_operand.vmem [shape: f32[4,32], index: 0, kind: input, shape index: {}]   ;;  %s56_s1 = inlined_call_operand.vmem [shape: f32[1,128], index: 1, kind: output, shape index: {}]  }
   0x1   :  { %v4_v0 = vld [vmem:[%s55_s0] sm:$0xf]  ;;  %s36_s0 = smov 96  }
   0x2   :  { %5 = vst [vmem:[#allocation1] sm:$0xf] %v4_v0 }
   0x9   :  { %v10_v1 = vld [vmem:[#allocation1 + $0x3] sm:$0x1]   ;;  %v22_v2 = vld [vmem:[#allocation1 + $0x1] sm:$0x1]   ;;  %v6_v3 = vld [vmem:[#allocation1] sm:$0x1]  }
   0xa   :  { %11 = vrot.lane.b32.xlu0 %v10_v1, %s36_s0  ;;  %23 = vrot.lane.b32.xlu1 %v22_v2, %s37_s8  ;;  %v16_v4 = vld [vmem:[#allocation1 + $0x2] sm:$0x1]   ;;  %8 = vst.msk [vmem:[#allocation0] sm:$0x1] %vm7_vm0, %v6_v3  }
   0xe   :  { %17 = vrot.lane.b32.xlu0 %v16_v4, %s38_s9 }
  0x7c   :  { %v12_v5 = vpop.permute.xlu0 %11   ;;  %v24_v6 = vpop.permute.xlu1 %23  }
  0x7d   :  { %14 = vst.msk [vmem:[#allocation0] sm:$0x1] %vm13_vm1, %v12_v5  }
  0x80   :  { %v18_v7 = vpop.permute.xlu0 %17  }
  0x81   :  { %20 = vst.msk [vmem:[#allocation0] sm:$0x1] %vm19_vm2, %v18_v7  }
  0x82   :  { %26 = vst.msk [vmem:[#allocation0] sm:$0x1] %vm25_vm3, %v24_v6  }
  0x89   :  { %v30_v8 = vld [vmem:[#allocation0] sm:$0x1] }
  0x8a   :  { %32 = vst [vmem:[%s56_s1] sm:$0x1] %v30_v8 }

// kernel: fn.1
= control target key start
LH: loop header
LB: loop body
LE: loop exit
PB: predicated region body
PF: predicated region fallthrough
CT: control target
= control target key end

     0   :  { %v9_v0 = vlaneseq  ;;  %s53_s0 = inlined_call_operand.vmem [shape: f32[2,128], index: 0, kind: input, shape index: {}]   ;;  %s54_s1 = inlined_call_operand.vmem [shape: f32[8,128], index: 1, kind: output, shape index: {}]  }
   0x1   :  { %v32_v3 = vld [vmem:[%s53_s0] ss:$0 sm:$0xff]  ;;  %v33_v5 = vld [vmem:[%s53_s0 + $0x1] ss:$0 sm:$0xff] }
   0x2   :  { %v10_v1 = vshrl.u32 %v9_v0, 7 }
   0x4   :  { %v11_v2 = vmul.u32 4, %v10_v1 }
   0x6   :  { %v14_v4 = vcvt.s32.f32 %v11_v2 }
   0x8   :  { %v20_v6 = vmul.f32 %v32_v3, %v14_v4 }
   0xa   :  { %v26_v7 = vadd.f32 %v33_v5, %v20_v6 }
   0xc   :  { %27 = vst [vmem:[%s54_s1] sm:$0xff] %v26_v7 }

</bundles_post_ra>
